<compile_context>
chip_gen: v5e
topology: v5e:2x2
jax: 0.10.0
libtpu: 0.0.40
codegen_flags: <defaults>
</compile_context>

<pallas_src>
import functools

import jax
import jax.numpy as jnp
from jax.experimental import pallas as pl
from jax.experimental.pallas import tpu as pltpu

LANES = 128
MAX_TILE_ROWS = 2048   # 2048 * 128 * 4 B = 1 MiB per f32 input buffer
NUM_SPLITS = 2         # leading "parallel" grid axis (v7x has 2 TensorCores)


def _round_up(x: int, m: int) -> int:
    return (x + m - 1) // m * m


def _mean_log_kernel(x_ref, o_ref, *, total_n, tile_rows, tiles_per_split,
                     total_tiles):
    c = pl.program_id(0)                 # parallel split (TensorCore) index
    t = pl.program_id(1)                 # sequential reduction step in this split
    linear = c * tiles_per_split + t     # logical tile index over the whole array

    # Fresh per-split accumulator (the output block is resident across t).
    @pl.when(t == 0)
    def _():
        o_ref[...] = jnp.zeros_like(o_ref)

    # Fast path: interior tiles -> pure EUP log + VPU elementwise add.
    @pl.when(linear < total_tiles - 1)
    def _():
        o_ref[...] += jnp.log(x_ref[...].astype(jnp.float32))

    # Slow path: the last (possibly ragged) logical tile and any fully
    # out-of-range padded tiles.  Mask by true flat element index so padding /
    # OOB garbage contributes exactly 0 to the sum.
    @pl.when(linear >= total_tiles - 1)
    def _():
        x = x_ref[...].astype(jnp.float32)
        row = jax.lax.broadcasted_iota(jnp.int32, x.shape, 0)
        lane = jax.lax.broadcasted_iota(jnp.int32, x.shape, 1)
        idx = linear * (tile_rows * LANES) + row * LANES + lane
        o_ref[...] += jnp.where(idx < total_n, jnp.log(x), 0.0)


def max_loss(acc: jax.Array) -> jax.Array:
    """mean(log(acc)) over all elements, computed in a Pallas TPU kernel."""
    total_n = acc.size
    flat = acc.reshape(-1)  # keep native dtype; cast to f32 happens in-kernel

    # View the flat data as (rows, 128).  Only if numel is not a multiple of
    # 128 do we pay for a tiny tail pad (pad value is irrelevant: the kernel
    # masks by true element index).
    if total_n % LANES != 0:
        pad = _round_up(total_n, LANES) - total_n
        flat = jnp.concatenate([flat, jnp.ones((pad,), dtype=flat.dtype)])
    rows = flat.size // LANES
    x2d = flat.reshape(rows, LANES)

    tile_rows = min(MAX_TILE_ROWS, _round_up(rows, 8))
    total_tiles = pl.cdiv(rows, tile_rows)
    tiles_per_split = pl.cdiv(total_tiles, NUM_SPLITS)

    kernel = functools.partial(
        _mean_log_kernel,
        total_n=total_n,
        tile_rows=tile_rows,
        tiles_per_split=tiles_per_split,
        total_tiles=total_tiles,
    )

    def x_index_map(c, t):
        # Clamp so tiles past the end of the array (from rounding the tile count
        # up to NUM_SPLITS * tiles_per_split) still read a valid block; their
        # contribution is masked to zero inside the kernel.
        return (jnp.minimum(c * tiles_per_split + t, total_tiles - 1), 0)

    partials = pl.pallas_call(
        kernel,
        out_shape=jax.ShapeDtypeStruct((NUM_SPLITS * tile_rows, LANES),
                                       jnp.float32),
        grid_spec=pltpu.PrefetchScalarGridSpec(
            num_scalar_prefetch=0,
            grid=(NUM_SPLITS, tiles_per_split),
            in_specs=[pl.BlockSpec((tile_rows, LANES), x_index_map)],
            out_specs=pl.BlockSpec((tile_rows, LANES), lambda c, t: (c, 0)),
        ),
        compiler_params=pltpu.CompilerParams(
            dimension_semantics=("parallel", "arbitrary"),
        ),
    )(x2d)

    # Tiny XLA epilogue: reduce the per-lane partial sums and divide by the
    # true (unpadded) element count.
    return jnp.sum(partials) / total_n


if __name__ == "__main__":
    key = jax.random.PRNGKey(0)
    # Positive inputs (log domain), NCHW-style shape: batch=2, channels=4, 16x16.
    acc = jax.random.uniform(
        key, (2, 4, 16, 16), dtype=jnp.float32, minval=0.05, maxval=1.0
    )

    result = max_loss(acc)
    jax.block_until_ready(result)

    # Reference check against plain JAX.
    ref = jnp.mean(jnp.log(acc))
    assert jnp.allclose(result, ref, atol=1e-5, rtol=1e-5), (result, ref)

    print("KERNEL_OK")
</pallas_src>

<mosaic_0001>
module attributes {stable_mosaic.version = 11 : i64} {
  func.func @_mean_log_kernel(%arg0: i32, %arg1: i32, %arg2: memref<16x128xf32, #tpu.memory_space<vmem>>, %arg3: memref<16x128xf32, #tpu.memory_space<vmem>>) attributes {dimension_semantics = [#tpu.dimension_semantics<parallel>, #tpu.dimension_semantics<arbitrary>], iteration_bounds = array<i64: 2, 1>, scalar_prefetch = 0 : i64, scratch_operands = 0 : i64, tpu.core_type = #tpu.core_type<tc>, window_params = [{transform_indices = @transform_0, window_bounds = array<i64: 16, 128>}, {transform_indices = @transform_1, window_bounds = array<i64: 16, 128>}]} {
    %c1_i32 = arith.constant 1 : i32
    %0 = arith.muli %arg0, %c1_i32 : i32
    %1 = arith.addi %0, %arg1 : i32
    %c0_i32 = arith.constant 0 : i32
    %2 = arith.cmpi eq, %arg1, %c0_i32 : i32
    %3 = arith.extui %2 : i1 to i32
    %c0_i32_0 = arith.constant 0 : i32
    %4 = arith.cmpi ne, %3, %c0_i32_0 : i32
    scf.if %4 {
      %cst = arith.constant 0.000000e+00 : f32
      %11 = vector.broadcast %cst : f32 to vector<16x128xf32>
      %c0 = arith.constant 0 : index
      %c0_5 = arith.constant 0 : index
      %12 = vector.load %arg3[%c0, %c0_5] : memref<16x128xf32, #tpu.memory_space<vmem>>, vector<16x128xf32>
      tpu.vector_store %arg3[%c0, %c0_5], %11 {strides = array<i32>} : memref<16x128xf32, #tpu.memory_space<vmem>>, vector<16x128xf32>,
    } else {
    }
    %c0_i32_1 = arith.constant 0 : i32
    %5 = arith.cmpi slt, %1, %c0_i32_1 : i32
    %6 = arith.extui %5 : i1 to i32
    %c0_i32_2 = arith.constant 0 : i32
    %7 = arith.cmpi ne, %6, %c0_i32_2 : i32
    scf.if %7 {
      %c0 = arith.constant 0 : index
      %c0_5 = arith.constant 0 : index
      %11 = vector.load %arg3[%c0, %c0_5] : memref<16x128xf32, #tpu.memory_space<vmem>>, vector<16x128xf32>
      %c0_6 = arith.constant 0 : index
      %c0_7 = arith.constant 0 : index
      %12 = vector.load %arg2[%c0_6, %c0_7] : memref<16x128xf32, #tpu.memory_space<vmem>>, vector<16x128xf32>
      %13 = math.log %12 : vector<16x128xf32>
      %14 = arith.addf %11, %13 : vector<16x128xf32>
      %c0_8 = arith.constant 0 : index
      %c0_9 = arith.constant 0 : index
      %15 = vector.load %arg3[%c0_8, %c0_9] : memref<16x128xf32, #tpu.memory_space<vmem>>, vector<16x128xf32>
      tpu.vector_store %arg3[%c0_8, %c0_9], %14 {strides = array<i32>} : memref<16x128xf32, #tpu.memory_space<vmem>>, vector<16x128xf32>,
    } else {
    }
    %c0_i32_3 = arith.constant 0 : i32
    %8 = arith.cmpi sge, %1, %c0_i32_3 : i32
    %9 = arith.extui %8 : i1 to i32
    %c0_i32_4 = arith.constant 0 : i32
    %10 = arith.cmpi ne, %9, %c0_i32_4 : i32
    scf.if %10 {
      %c0 = arith.constant 0 : index
      %c0_5 = arith.constant 0 : index
      %11 = vector.load %arg2[%c0, %c0_5] : memref<16x128xf32, #tpu.memory_space<vmem>>, vector<16x128xf32>
      %12 = tpu.iota {dimensions = array<i32: 0>} : vector<16x128xi32>
      %13 = tpu.iota {dimensions = array<i32: 1>} : vector<16x128xi32>
      %c2048_i32 = arith.constant 2048 : i32
      %14 = arith.muli %1, %c2048_i32 : i32
      %c128_i32 = arith.constant 128 : i32
      %15 = vector.broadcast %c128_i32 : i32 to vector<16x128xi32>
      %16 = arith.muli %12, %15 : vector<16x128xi32>
      %17 = vector.broadcast %14 : i32 to vector<16x128xi32>
      %18 = arith.addi %17, %16 : vector<16x128xi32>
      %19 = arith.addi %18, %13 : vector<16x128xi32>
      %c0_6 = arith.constant 0 : index
      %c0_7 = arith.constant 0 : index
      %20 = vector.load %arg3[%c0_6, %c0_7] : memref<16x128xf32, #tpu.memory_space<vmem>>, vector<16x128xf32>
      %c2048_i32_8 = arith.constant 2048 : i32
      %21 = vector.broadcast %c2048_i32_8 : i32 to vector<16x128xi32>
      %22 = arith.cmpi slt, %19, %21 : vector<16x128xi32>
      %23 = math.log %11 : vector<16x128xf32>
      %cst = arith.constant 0.000000e+00 : f32
      %24 = vector.broadcast %cst : f32 to vector<16x128xf32>
      %25 = arith.select %22, %23, %24 : vector<16x128xi1>, vector<16x128xf32>
      %26 = arith.addf %20, %25 : vector<16x128xf32>
      %c0_9 = arith.constant 0 : index
      %c0_10 = arith.constant 0 : index
      %27 = vector.load %arg3[%c0_9, %c0_10] : memref<16x128xf32, #tpu.memory_space<vmem>>, vector<16x128xf32>
      tpu.vector_store %arg3[%c0_9, %c0_10], %26 {strides = array<i32>} : memref<16x128xf32, #tpu.memory_space<vmem>>, vector<16x128xf32>,
    } else {
    }
    return
  }
  func.func @transform_0(%arg0: i32, %arg1: i32) -> (i32, i32) {
    %c1_i32 = arith.constant 1 : i32
    %0 = arith.muli %arg0, %c1_i32 : i32
    %1 = arith.addi %0, %arg1 : i32
    %c0_i32 = arith.constant 0 : i32
    %2 = arith.minsi %1, %c0_i32 : i32
    %c0_i32_0 = arith.constant 0 : i32
    %c0_i32_1 = arith.constant 0 : i32
    return %2, %c0_i32_0 : i32, i32
  }
  func.func @transform_1(%arg0: i32, %arg1: i32) -> (i32, i32) {
    %c0_i32 = arith.constant 0 : i32
    %c0_i32_0 = arith.constant 0 : i32
    return %arg0, %c0_i32 : i32, i32
  }
}

</mosaic_0001>

<bundles_post_ra>
// kernel: tpu_custom_call.1
= control target key start
LH: loop header
LB: loop body
LE: loop exit
PB: predicated region body
PF: predicated region fallthrough
CT: control target
= control target key end

     0   :  { %6 = vsyncpa [#allocation3], 0  ;;  %s756_s0 = inlined_call_operand.hbm [shape: f32[16,128], index: 0, kind: input, shape index: {}]   ;;  %s757_s1 = inlined_call_operand.hbm [shape: f32[32,128], index: 1, kind: output, shape index: {}]  }
   0x1   :  { %8 = vsyncpa [#allocation3 + $0x1], 0 }
   0x2   :  { %9 = vsyncpa [#allocation4], 0 }
   0x3   :  { %11 = vsyncpa [#allocation4 + $0x1], 0  ;;  %s586_s6 = smov 0   ;;  %s588_s7 = smov 0  }
   0x4   :  { %s590_s8 = smov 0   ;;  %s592_s9 = smov 0  }
   0x5   :  { %s594_s10 = smov 0   ;;  %s596_s11 = smov 0  }
   0x6   :  { %s598_s12 = smov 0   ;;  %s600_s13 = smov 0  }
   0x7 LB: > { %s316_s14 = sadd.s32 4294967295, %s568_s13   ;;  %s317_s15 = sadd.s32 4294967294, %s568_s13   ;;  %s568_s13 = sphi %s600_s13, %s17_s13   ;;  %s564_s12 = sphi %s598_s12, %s768_s12   ;;  %s560_s11 = sphi %s596_s11, %s767_s11   ;;  %s556_s10 = sphi %s594_s10, %s746_s10   ;;  %s552_s9 = sphi %s592_s9, %s766_s9   ;;  %s548_s8 = sphi %s590_s8, %s765_s8   ;;  %s544_s7 = sphi %s588_s7, %s764_s7   ;;  %s540_s6 = sphi %s586_s6, %s763_s6  }
   0x8   : > { %s29_s16 = sadd.s32 1, %s564_s12  ;;  %p537_p1 = scmp.ne.s32.totalorder %s556_s10, 0 }
   0x9   : > { %p31_p0 = scmp.ge.s32.totalorder %s29_s16, 2  ;;  %p50_p2 = scmp.eq.s32.totalorder %s568_s13, 0 }
   0xa   : > { %p55_p3 = scmp.ne.s32.totalorder %s556_s10, %s552_s9  ;;  %p56_p5 = scmp.eq.s32.totalorder %s316_s14, 0 }
   0xb   : > { %s770_s16 = smov (%p31_p0, %s29_s16), 0  ;;  %p632_p4 = por %p537_p1, %p50_p2 }
   0xc   : > { %p636_p6 = por %p56_p5, %p55_p3  ;;  %s65_s19 = ssub.s32 %s564_s12, %s770_s16 }
   0xd   : > { %p66_p7 = scmp.eq.s32.totalorder %s65_s19, 0  ;;  %s68_s20 = sadd.s32 1, %s548_s8 }
   0xe   : > { %p78_p8 = scmp.ne.s32.totalorder %s548_s8, %s544_s7  ;;  %p79_p9 = scmp.eq.s32.totalorder %s316_s14, 1 }
   0xf   : > { %s644_s21 = scalar_select %p66_p7, %s548_s8, %s68_s20  }
  0x10   : > { %p84_p10 = scmp.ne.s32.totalorder %s544_s7, %s540_s6  ;;  %p85_p11 = scmp.eq.s32.totalorder %s317_s15, 1 }
  0x11   : > { %p650_p12 = por %p79_p9, %p78_p8  ;;  %p319_p13 = scmp.ge.s32.totalorder %s568_s13, 2 }
  0x12   : > { %p655_p0 = por %p85_p11, %p84_p10  ;;  %p348_p1 = scmp.lt.s32.totalorder %s568_s13, 2 }
  0x13   : > { %s118_s26 = sshll.u32 %s756_s0, 4  ;;  %s570_s27 = smov [#allocation2]   ;;  %s119_s26 = int_to_ptr.hbm [resolvable:$true] %s118_s26 }
  0x14   : > { %s120_s28 = sshll.u32 %s570_s27, 4  ;;  %p665_p2 = pnand %p348_p1, %p632_p4  ;;  %s121_s28 = int_to_ptr.vmem [resolvable:$true] %s120_s28 }
  0x15   : > { %p323_p3 = scmp.ge.s32.totalorder %s568_s13, 1  ;;  %p128_p5 = scmp.lt.s32.totalorder %s568_s13, 3 }
  0x16   : > { %s435_s30 = sshra.s32 %s119_s26, 4  ;;  %p439_p8 = pneg %p665_p2  ;;  %s436_s30 = int_to_ptr.hbm [resolvable:$true] %s435_s30 }
  0x17   : > { %s437_s2 = scalar_lea.hbm %s436_s30, 16  ;;  %s442_s5 = scalar_lea.hbm %s756_s0, 16 }
  0x18   : > { %p438_p7 = scmp.ne.s32.totalorder %s436_s30, %s437_s2  ;;  %p444_p11 = scmp.lt.s32.totalorder %s442_s5, %s437_s2 }
  0x1a   : > { %p440_p9 = pnand %p439_p8, %p438_p7 }
  0x1c   : > { %p441_p10 = pneg %p440_p9 }
  0x1e   : > { %p446_p4 = pnand %p444_p11, %p441_p10 }
  0x20   : > { %449 = shalt.err (!%p446_p4)
}
  0x21   : > { %s571_s9 = smov 128   ;;  %s572_s14 = smov 8  }
  0x22   : > { %343 = dma.hbm_to_vmem [thread:$0]  (!%p665_p2), %s119_s26, 256, %s121_s28, [#allocation3], %s571_s9, %s571_s9, %s572_s14  }
  0x23   : > { %p129_p1 = pnand %p323_p3, %p128_p5 }
  0x24   : > { %s134_s15 = sand.u32 (!%p129_p1), 1, %s556_s10  }
  0x25   : > { %132 = sbr.rel (%p129_p1) target bundleno = 104 (0x68), region = 24  ;;  %s324_s17 = sshll.u32 (!%p129_p1), %s134_s15, 4 }
  0x26   : > { %s135_s19 = scalar_lea.sflag (!%p129_p1), [#allocation3], %s134_s15  ;;  %s683_s20 = scalar_lea.vmem (!%p129_p1), [#allocation2], %s324_s17 }
  0x2a   : > { %530 = dma.done.wait (%p636_p6), %s135_s19, 256  }
  0x2b   : > { %532 = vsyncadd (%p636_p6), %s135_s19, 4294967040  ;;  %s155_s24 = sand.u32 1, %s544_s7   ;;  %v573_v0 = vmov 0.0   ;;  %p326_p2 = scmp.ge.s32.totalorder %s560_s11, 0 }
  0x2c   : > { %s325_s25 = sshll.u32 %s155_s24, 4 }
  0x2d   : > { %s692_s26 = scalar_lea.vmem [#allocation5], %s325_s25  ;;  %173 = sbr.rel (%p326_p2) target bundleno = 64 (0x40), region = 36 }
  0x2e   : > { %168 = vst [vmem:[%s692_s26] sm:$0xff] %v573_v0 }
  0x2f   : > { %169 = vst [vmem:[%s692_s26 + $0x8] sm:$0xff] %v573_v0 }
  0x32   : > { %v176_v1 = vld [vmem:[%s683_s20] sm:$0xff]  ;;  %v177_v2 = vld [vmem:[%s683_s20 + $0x8] sm:$0xff] }
  0x33   : > { %427 = vlog2.f32 %v176_v1 }
  0x34   : > { %429 = vlog2.f32 %v177_v2 }
  0x35   : > { %v174_v4 = vld [vmem:[%s692_s26] sm:$0xff] }
  0x36   : > { %v175_v7 = vld [vmem:[%s692_s26 + $0x8] sm:$0xff] }
  0x39   : > { %v428_v3 = vpop.eup %427 }
  0x3a   : > { %v430_v5 = vpop.eup %429  ;;  %v179_v6 = vmul.f32 0.6931472, %v428_v3 }
  0x3b   : > { %v181_v8 = vmul.f32 0.6931472, %v430_v5 }
  0x3c   : > { %v182_v9 = vadd.f32 %v179_v6, %v174_v4 }
  0x3d   : > { %v183_v10 = vadd.f32 %v181_v8, %v175_v7 }
  0x3e   : > { %184 = vst [vmem:[%s692_s26] sm:$0xff] %v182_v9 }
  0x3f   : > { %185 = vst [vmem:[%s692_s26 + $0x8] sm:$0xff] %v183_v10 }
  0x40 PF: > { %p327_p6 = scmp.lt.s32.totalorder %s560_s11, 0 }
  0x41   : > { %s328_s18 = sshll.u32 (!%p327_p6), %s560_s11, 11 }
  0x42   : > { %189 = sbr.rel (%p327_p6) target bundleno = 88 (0x58), region = 40 }
  0x47   : > { %v190_v11 = vld [vmem:[%s683_s20] sm:$0xff]  ;;  %v192_v12 = vlaneseq  ;;  %v191_v13 = vld [vmem:[%s683_s20 + $0x8] sm:$0xff]  ;;  %v200_v15 = vstv %s328_s18 }
  0x48   : > { %431 = vlog2.f32 %v190_v11  ;;  %v205_v26 = vld [vmem:[%s692_s26] sm:$0xff]  ;;  %v206_v30 = vld [vmem:[%s692_s26 + $0x8] sm:$0xff] }
  0x49   : > { %v193_v14 = vshrl.u32 %v192_v12, 7  ;;  %433 = vlog2.f32 %v191_v13  ;;  %v196_v16 = vand.u32 127, %v192_v12 }
  0x4b   : > { %v198_v17 = vmul.u32 128, %v193_v14  ;;  %v194_v18 = vadd.s32 8, %v193_v14 }
  0x4d   : > { %v201_v19 = vadd.s32 %v200_v15, %v198_v17  ;;  %v199_v20 = vmul.u32 128, %v194_v18 }
  0x4e   : > { %v432_v21 = vpop.eup %431 }
  0x4f   : > { %v434_v22 = vpop.eup %433  ;;  %v203_v23 = vadd.s32 %v201_v19, %v196_v16  ;;  %v210_v24 = vmul.f32 0.6931472, %v432_v21  ;;  %v202_v25 = vadd.s32 %v200_v15, %v199_v20 }
  0x50   : > { %v212_v27 = vmul.f32 0.6931472, %v434_v22 }
  0x51   : > { %vm207_vm0 = vcmp.lt.s32.totalorder %v203_v23, 2048  ;;  %v204_v28 = vadd.s32 %v202_v25, %v196_v16 }
  0x52   : > { %v213_v29 = vsel %vm207_vm0, %v210_v24, 0.0 }
  0x53   : > { %v215_v31 = vadd.f32 %v213_v29, %v205_v26  ;;  %vm208_vm1 = vcmp.lt.s32.totalorder %v204_v28, 2048 }
  0x54   : > { %v214_v32 = vsel %vm208_vm1, %v212_v27, 0.0 }
  0x55   : > { %217 = vst [vmem:[%s692_s26] sm:$0xff] %v215_v31  ;;  %v216_v33 = vadd.f32 %v214_v32, %v206_v30 }
  0x57   : > { %218 = vst [vmem:[%s692_s26 + $0x8] sm:$0xff] %v216_v33 }
  0x58 PF: > { %s335_s27 = sshll.u32 %s560_s11, 4  ;;  %s232_s2 = sshll.u32 %s692_s26, 4  ;;  %s233_s2 = int_to_ptr.vmem [resolvable:$true] %s232_s2 }
  0x59   : > { %s231_s30 = scalar_lea.hbm %s757_s1, %s335_s27  ;;  %s220_s4 = scalar_lea.sflag [#allocation4], %s155_s24 }
  0x5a   : > { %s234_s3 = sshll.u32 %s231_s30, 4  ;;  %s485_s11 = scalar_lea.hbm %s757_s1, 32  ;;  %s235_s3 = int_to_ptr.hbm [resolvable:$true] %s234_s3 }
  0x5b   : > { %s479_s5 = sshra.s32 %s235_s3, 4  ;;  %s480_s5 = int_to_ptr.hbm [resolvable:$true] %s479_s5 }
  0x5c   : > { %s481_s9 = scalar_lea.hbm %s480_s5, 16  ;;  %p486_p8 = scmp.lt.s32.totalorder %s480_s5, %s757_s1 }
  0x5d   : > { %p482_p3 = scmp.ne.s32.totalorder %s480_s5, %s481_s9  ;;  %p487_p9 = scmp.lt.s32.totalorder %s485_s11, %s481_s9 }
  0x5f   : > { %p483_p5 = pnand %p482_p3, %p650_p12  ;;  %p488_p10 = por %p487_p9, %p486_p8 }
  0x61   : > { %p484_p7 = pneg %p483_p5 }
  0x63   : > { %p489_p11 = pnand %p488_p10, %p484_p7 }
  0x65   : > { %492 = shalt.err (!%p489_p11)
}
  0x66   : > { %s574_s20 = smov 128   ;;  %s575_s24 = smov 8  }
  0x67   : > { %338 = dma.vmem_to_hbm [thread:$0]  (%p650_p12), %s233_s2, 256, %s235_s3, %s220_s4, %s574_s20, %s574_s20, %s575_s24  }
  0x68 PF: > { %s249_s25 = sand.u32 1, %s540_s6   ;;  %p345_p4 = pnand %p319_p13, %p655_p0 }
  0x69   : > { %s250_s26 = scalar_lea.sflag [#allocation4], %s249_s25 }
  0x6a   : > { %p346_p1 = pneg %p345_p4 }
  0x6c   : > { %534 = dma.done.wait (%p346_p1), %s250_s26, 256  }
  0x6d   : > { %536 = vsyncadd (%p346_p1), %s250_s26, 4294967040  ;;  %s17_s13 = sadd.s32 1, %s568_s13   ;;  %s763_s6 = smov %s544_s7 }
  0x6e   : > { %p14_p2 = scmp.ge.s32.totalorder %s17_s13, 4   ;;  %s764_s7 = smov %s548_s8 }
  0x6f   : > { %s765_s8 = smov %s644_s21  ;;  %s766_s9 = smov %s556_s10 }
  0x70   : > { %s746_s10 = smov 0   ;;  %s767_s11 = smov %s564_s12 }
  0x71   : > { %s768_s12 = smov %s770_s16  ;;  %16 = sbr.rel (!%p14_p2) target bundleno = 7 (0x7), region = 81 }
  0x76   :  { %256 = vsyncpa [#allocation3], 1 }
  0x77   :  { %258 = vsyncpa [#allocation3 + $0x1], 1 }
  0x78   :  { %259 = vsyncpa [#allocation4], 1 }
  0x79   :  { %261 = vsyncpa [#allocation4 + $0x1], 1 }

</bundles_post_ra>
